<compile_context>
chip_gen: v5e
topology: v5e:2x2
jax: 0.10.0
libtpu: 0.0.40
codegen_flags: <defaults>
</compile_context>

<pallas_src>
import math
import functools

import jax
import jax.numpy as jnp
from jax import lax
from jax.experimental import pallas as pl
from jax.experimental.pallas import tpu as pltpu


def make_pos_embedding(emb_size: int, maxlen: int = 5000, dtype=jnp.float32):
    """Sinusoidal table, identical math to the torch __init__ (handles odd emb_size)."""
    den = jnp.exp(
        -jnp.arange(0, emb_size, 2, dtype=jnp.float32) * math.log(10000.0) / emb_size
    )
    pos = jnp.arange(0, maxlen, dtype=jnp.float32).reshape(maxlen, 1)
    pe = jnp.zeros((maxlen, emb_size), dtype=jnp.float32)
    pe = pe.at[:, 0::2].set(jnp.sin(pos * den))
    den_cos = den[:-1] if emb_size % 2 == 1 else den
    pe = pe.at[:, 1::2].set(jnp.cos(pos * den_cos))
    return pe.astype(dtype)


def _fmix32(h):
    """murmur3 finalizer on int32 lanes. (h >> k) & mask == logical shift;
    int32 multiplies wrap mod 2^32, matching the uint32 reference math."""
    h = h ^ ((h >> 16) & jnp.int32(0x0000FFFF))
    h = h * jnp.int32(-2048144789)        # 0x85EBCA6B
    h = h ^ ((h >> 13) & jnp.int32(0x0007FFFF))
    h = h * jnp.int32(-1028477613)        # 0xC2B2AE35
    h = h ^ ((h >> 16) & jnp.int32(0x0000FFFF))
    return h


def _posenc_eval_kernel(x_ref, pos_ref, o_ref):
    # Pure broadcast add; dropout is identity in eval mode / p == 0.
    o_ref[...] = (x_ref[...] + pos_ref[...]).astype(o_ref.dtype)


def _posenc_dropout_kernel(seed_ref, x_ref, pos_ref, o_ref, *, p: float):
    added = x_ref[...] + pos_ref[...]

    ts, B, E = x_ref.shape
    # Global element index -> mask is independent of the tiling choice.
    r = lax.broadcasted_iota(jnp.int32, (ts, B, E), 0)
    b = lax.broadcasted_iota(jnp.int32, (ts, B, E), 1)
    e = lax.broadcasted_iota(jnp.int32, (ts, B, E), 2)
    tile_off = pl.program_id(0) * (ts * B * E)
    idx = tile_off + (r * B + b) * E + e

    seed_mix = seed_ref[0] * jnp.int32(-1640531527)   # 0x9E3779B9 (golden ratio)
    bits = _fmix32(idx ^ seed_mix)

    # Inverted dropout: keep w.p. (1 - p), integer compare on 31 mixed bits.
    u31 = bits & jnp.int32(0x7FFFFFFF)
    thresh = jnp.int32(min(int(round(p * 2147483648.0)), 2147483647))
    keep = u31 >= thresh
    scale = jnp.asarray(1.0 / (1.0 - p), dtype=added.dtype)
    o_ref[...] = jnp.where(keep, added * scale, jnp.zeros_like(added)).astype(o_ref.dtype)


def positional_encoding(x, pos_embedding, *, dropout_p: float = 0.1,
                        train: bool = False, seed: int = 0, seq_tile=None):
    """x: (S, B, E). Returns dropout(x + pos_embedding[:S]) with shape (S, B, E)."""
    S, B, E = x.shape
    pos = pos_embedding[:S].reshape(S, 1, E).astype(x.dtype)

    p = float(dropout_p)
    apply_dropout = bool(train) and p > 0.0
    if apply_dropout and p >= 1.0:
        return jnp.zeros_like(x)

    # Tile heuristic: ~4 MiB per x tile so the grid has many steps and the
    # BlockSpec pipeline can overlap DMA with the (small) VPU work.
    itemsize = jnp.dtype(x.dtype).itemsize
    if seq_tile is None:
        row_bytes = max(B * E * itemsize, 1)
        ts = max(1, min(S, (4 * 1024 * 1024) // row_bytes))
        if ts >= 8:
            ts -= ts % 8
    else:
        ts = max(1, min(int(seq_tile), S))
    grid = (pl.cdiv(S, ts),)

    compiler_params = pltpu.CompilerParams(
        # No carried state (stateless hash) -> safe to shard across cores.
        dimension_semantics=("parallel",),
        # Above the 16/32 MiB scoped defaults (v5e/v6e), below v7x's 64 MiB.
        vmem_limit_bytes=48 * 1024 * 1024,
    )

    if apply_dropout:
        kernel = functools.partial(_posenc_dropout_kernel, p=p)
        grid_spec = pltpu.PrefetchScalarGridSpec(
            num_scalar_prefetch=1,
            grid=grid,
            in_specs=[
                pl.BlockSpec((ts, B, E), lambda i, seed_ref: (i, 0, 0)),
                pl.BlockSpec((ts, 1, E), lambda i, seed_ref: (i, 0, 0)),
            ],
            out_specs=pl.BlockSpec((ts, B, E), lambda i, seed_ref: (i, 0, 0)),
        )
        seed_arr = jnp.array([seed], dtype=jnp.int32)
        args = (seed_arr, x, pos)
    else:
        kernel = _posenc_eval_kernel
        grid_spec = pltpu.PrefetchScalarGridSpec(
            num_scalar_prefetch=0,
            grid=grid,
            in_specs=[
                pl.BlockSpec((ts, B, E), lambda i: (i, 0, 0)),
                pl.BlockSpec((ts, 1, E), lambda i: (i, 0, 0)),
            ],
            out_specs=pl.BlockSpec((ts, B, E), lambda i: (i, 0, 0)),
        )
        args = (x, pos)

    return pl.pallas_call(
        kernel,
        out_shape=jax.ShapeDtypeStruct((S, B, E), x.dtype),
        grid_spec=grid_spec,
        compiler_params=compiler_params,
    )(*args)


if __name__ == "__main__":
    # Small shapes: seq=8, batch=2, emb=32
    S, B, E = 8, 2, 32
    key = jax.random.PRNGKey(0)
    x = jax.random.normal(key, (S, B, E), dtype=jnp.float32)

    pe = make_pos_embedding(E, maxlen=64)
    ref = x + pe[:S].reshape(S, 1, E)

    # Eval mode (dropout is identity) -- exact reference check.
    out_eval = positional_encoding(x, pe, dropout_p=0.1, train=False, seq_tile=4)
    out_eval = jax.block_until_ready(out_eval)
    assert out_eval.shape == (S, B, E)
    assert jnp.allclose(out_eval, ref, atol=1e-6), "eval-mode mismatch"

    # Training mode: zero w.p. p, survivors scaled by 1/(1-p). RNG bits differ
    # from torch's generator, but the dropout semantics are preserved.
    p = 0.1
    out_train = positional_encoding(x, pe, dropout_p=p, train=True, seed=123, seq_tile=4)
    out_train = jax.block_until_ready(out_train)
    assert out_train.shape == (S, B, E)
    scaled_ref = ref / (1.0 - p)
    ok = jnp.logical_or(out_train == 0.0,
                        jnp.isclose(out_train, scaled_ref, rtol=1e-5, atol=1e-6))
    assert bool(jnp.all(ok)), "train-mode dropout semantics mismatch"

    # The mask comes from a global-index hash, so it must not depend on tiling.
    out_train2 = positional_encoding(x, pe, dropout_p=p, train=True, seed=123, seq_tile=8)
    out_train2 = jax.block_until_ready(out_train2)
    assert jnp.allclose(out_train, out_train2), "mask should be tiling-invariant"

    print("KERNEL_OK")
</pallas_src>

<mosaic_0001>
module attributes {stable_mosaic.version = 11 : i64} {
  func.func @_posenc_eval_kernel(%arg0: i32, %arg1: memref<4x2x32xf32, #tpu.memory_space<vmem>>, %arg2: memref<4x1x32xf32, #tpu.memory_space<vmem>>, %arg3: memref<4x2x32xf32, #tpu.memory_space<vmem>>) attributes {dimension_semantics = [#tpu.dimension_semantics<parallel>], iteration_bounds = array<i64: 2>, scalar_prefetch = 0 : i64, scratch_operands = 0 : i64, tpu.core_type = #tpu.core_type<tc>, window_params = [{transform_indices = @transform_0, window_bounds = array<i64: 4, 2, 32>}, {transform_indices = @transform_1, window_bounds = array<i64: 4, 1, 32>}, {transform_indices = @transform_2, window_bounds = array<i64: 4, 2, 32>}]} {
    %c0 = arith.constant 0 : index
    %c0_0 = arith.constant 0 : index
    %c0_1 = arith.constant 0 : index
    %0 = vector.load %arg1[%c0, %c0_0, %c0_1] : memref<4x2x32xf32, #tpu.memory_space<vmem>>, vector<4x2x32xf32>
    %c0_2 = arith.constant 0 : index
    %c0_3 = arith.constant 0 : index
    %c0_4 = arith.constant 0 : index
    %1 = vector.load %arg2[%c0_2, %c0_3, %c0_4] : memref<4x1x32xf32, #tpu.memory_space<vmem>>, vector<4x1x32xf32>
    %2 = vector.broadcast %1 : vector<4x1x32xf32> to vector<4x2x32xf32>
    %3 = arith.addf %0, %2 : vector<4x2x32xf32>
    %c0_5 = arith.constant 0 : index
    %c0_6 = arith.constant 0 : index
    %c0_7 = arith.constant 0 : index
    %4 = vector.load %arg3[%c0_5, %c0_6, %c0_7] : memref<4x2x32xf32, #tpu.memory_space<vmem>>, vector<4x2x32xf32>
    tpu.vector_store %arg3[%c0_5, %c0_6, %c0_7], %3 {strides = array<i32>} : memref<4x2x32xf32, #tpu.memory_space<vmem>>, vector<4x2x32xf32>,
    return
  }
  func.func @transform_0(%arg0: i32) -> (i32, i32, i32) {
    %c0_i32 = arith.constant 0 : i32
    %c0_i32_0 = arith.constant 0 : i32
    %c0_i32_1 = arith.constant 0 : i32
    return %arg0, %c0_i32, %c0_i32_0 : i32, i32, i32
  }
  func.func @transform_1(%arg0: i32) -> (i32, i32, i32) {
    %c0_i32 = arith.constant 0 : i32
    %c0_i32_0 = arith.constant 0 : i32
    %c0_i32_1 = arith.constant 0 : i32
    return %arg0, %c0_i32, %c0_i32_0 : i32, i32, i32
  }
  func.func @transform_2(%arg0: i32) -> (i32, i32, i32) {
    %c0_i32 = arith.constant 0 : i32
    %c0_i32_0 = arith.constant 0 : i32
    %c0_i32_1 = arith.constant 0 : i32
    return %arg0, %c0_i32, %c0_i32_0 : i32, i32, i32
  }
}

</mosaic_0001>

<bundles_post_ra>
// kernel: tpu_custom_call.1
= control target key start
LH: loop header
LB: loop body
LE: loop exit
PB: predicated region body
PF: predicated region fallthrough
CT: control target
= control target key end

     0   :  { %7 = vsyncpa [#allocation3], 0  ;;  %s749_s0 = inlined_call_operand.hbm [shape: f32[8,2,32], index: 0, kind: input, shape index: {}]   ;;  %s750_s1 = inlined_call_operand.hbm [shape: f32[8,1,32], index: 1, kind: input, shape index: {}]   ;;  %s751_s2 = inlined_call_operand.hbm [shape: f32[8,2,32], index: 2, kind: output, shape index: {}]  }
   0x1   :  { %9 = vsyncpa [#allocation3 + $0x1], 0 }
   0x2   :  { %10 = vsyncpa [#allocation6], 0 }
   0x3   :  { %12 = vsyncpa [#allocation6 + $0x1], 0 }
   0x4   :  { %13 = vsyncpa [#allocation4], 0 }
   0x5   :  { %15 = vsyncpa [#allocation4 + $0x1], 0  ;;  %s582_s9 = smov 0   ;;  %s584_s10 = smov 0  }
   0x6   :  { %s586_s11 = smov 0   ;;  %s588_s12 = smov 0  }
   0x7 LB: > { %s603_s13 = sadd.s32 4294967295, %s559_s12   ;;  %s349_s14 = sadd.s32 4294967294, %s559_s12   ;;  %s559_s12 = sphi %s588_s12, %s762_s12   ;;  %s555_s11 = sphi %s586_s11, %s761_s11   ;;  %s551_s10 = sphi %s584_s10, %s760_s10   ;;  %s547_s9 = sphi %s582_s9, %s759_s9  }
   0x8   : > { %s607_s15 = sadd.s32 1, %s559_s12   ;;  %s28_s16 = sadd.s32 1, %s555_s11 }
   0x9   : > { %s25_s17 = ssub.s32 %s559_s12, %s607_s15  ;;  %p35_p0 = scmp.ne.s32.totalorder %s555_s11, %s551_s10 }
   0xa   : > { %p26_p1 = scmp.eq.s32.totalorder %s25_s17, 0  ;;  %p36_p2 = scmp.eq.s32.totalorder %s559_s12, 0 }
   0xb   : > { %p41_p3 = scmp.ne.s32.totalorder %s551_s10, %s547_s9  ;;  %p42_p4 = scmp.eq.s32.totalorder %s603_s13, 0 }
   0xc   : > { %s619_s18 = scalar_select %p26_p1, %s555_s11, %s28_s16  }
   0xd   : > { %p621_p5 = por %p36_p2, %p35_p0  ;;  %p625_p6 = por %p42_p4, %p41_p3 }
   0xe   : > { %p91_p7 = scmp.eq.s32.totalorder %s603_s13, 1  ;;  %p97_p8 = scmp.eq.s32.totalorder %s349_s14, 1 }
   0xf   : > { %p385_p10 = scmp.lt.s32.totalorder %s559_s12, 2  ;;  %s641_s23 = sand.u32 1, %s555_s11  }
  0x10   : > { %p632_p11 = por %p91_p7, %p35_p0  ;;  %p636_p12 = por %p97_p8, %p41_p3 }
  0x11   : > { %s366_s24 = sshll.u32 %s559_s12, 3  ;;  %s352_s25 = sshll.u32 %s641_s23, 3 }
  0x12   : > { %s126_s28 = scalar_lea.hbm %s749_s0, %s366_s24  ;;  %s121_s30 = scalar_lea.vmem [#allocation2], %s352_s25 }
  0x13   : > { %s127_s29 = sshll.u32 %s126_s28, 4  ;;  %s129_s3 = sshll.u32 %s121_s30, 4  ;;  %s128_s29 = int_to_ptr.hbm [resolvable:$true] %s127_s29  ;;  %s130_s3 = int_to_ptr.vmem [resolvable:$true] %s129_s3 }
  0x14   : > { %p650_p13 = pnand %p385_p10, %p621_p5  ;;  %p357_p0 = scmp.ge.s32.totalorder %s559_s12, 1 }
  0x15   : > { %p158_p1 = scmp.lt.s32.totalorder %s559_s12, 3  ;;  %s118_s5 = scalar_lea.sflag [#allocation3], %s641_s23 }
  0x16   : > { %s429_s6 = sshra.s32 %s128_s29, 4  ;;  %p433_p3 = pneg %p650_p13  ;;  %s430_s6 = int_to_ptr.hbm [resolvable:$true] %s429_s6 }
  0x17   : > { %s431_s7 = scalar_lea.hbm %s430_s6, 8  ;;  %s436_s16 = scalar_lea.hbm %s749_s0, 16 }
  0x18   : > { %p432_p2 = scmp.ne.s32.totalorder %s430_s6, %s431_s7  ;;  %p437_p5 = scmp.lt.s32.totalorder %s430_s6, %s749_s0 }
  0x19   : > { %p438_p8 = scmp.lt.s32.totalorder %s436_s16, %s431_s7 }
  0x1a   : > { %p434_p4 = pnand %p433_p3, %p432_p2 }
  0x1b   : > { %p439_p10 = por %p438_p8, %p437_p5 }
  0x1c   : > { %p435_p7 = pneg %p434_p4 }
  0x1e   : > { %p440_p9 = pnand %p439_p10, %p435_p7 }
  0x20   : > { %443 = shalt.err (!%p440_p9)
}
  0x21   : > { %s561_s24 = smov 32   ;;  %s562_s25 = smov 2  }
  0x22   : > { %377 = dma.hbm_to_vmem [thread:$0]  (!%p650_p13), %s128_s29, 128, %s130_s3, %s118_s5, %s561_s24, %s561_s24, %s562_s25  }
  0x23   : > { %p674_p2 = pnand %p357_p0, %p158_p1  ;;  %s355_s27 = sshll.u32 %s641_s23, 2 }
  0x24   : > { %s356_s28 = sshll.u32 %s559_s12, 2  ;;  %s143_s14 = scalar_lea.vmem [#allocation5], %s355_s27 }
  0x25   : > { %s147_s7 = scalar_lea.hbm %s750_s1, %s356_s28  ;;  %s150_s16 = sshll.u32 %s143_s14, 4  ;;  %s151_s16 = int_to_ptr.vmem [resolvable:$true] %s150_s16 }
  0x26   : > { %s148_s8 = sshll.u32 %s147_s7, 4  ;;  %s140_s17 = scalar_lea.sflag [#allocation6], %s641_s23  ;;  %s149_s8 = int_to_ptr.hbm [resolvable:$true] %s148_s8 }
  0x27   : > { %s459_s19 = sshra.s32 %s149_s8, 4  ;;  %s466_s24 = scalar_lea.hbm %s750_s1, 8  ;;  %s460_s19 = int_to_ptr.hbm [resolvable:$true] %s459_s19 }
  0x28   : > { %s461_s29 = scalar_lea.hbm %s460_s19, 4  ;;  %p467_p4 = scmp.lt.s32.totalorder %s460_s19, %s750_s1 }
  0x29   : > { %p462_p9 = scmp.ne.s32.totalorder %s460_s19, %s461_s29  ;;  %p468_p7 = scmp.lt.s32.totalorder %s466_s24, %s461_s29 }
  0x2b   : > { %p464_p0 = pnand %p462_p9, %p433_p3  ;;  %p469_p5 = por %p468_p7, %p467_p4 }
  0x2d   : > { %p465_p1 = pneg %p464_p0 }
  0x2f   : > { %p470_p8 = pnand %p469_p5, %p465_p1 }
  0x31   : > { %473 = shalt.err (!%p470_p8)
}
  0x32   : > { %s563_s23 = smov 16   ;;  %s564_s27 = smov 1  }
  0x33   : > { %380 = dma.hbm_to_vmem [thread:$0]  (!%p650_p13), %s149_s8, 64, %s151_s16, %s140_s17, %s563_s23, %s563_s23, %s564_s27  }
  0x34   : > { %162 = sbr.rel (%p674_p2) target bundleno = 78 (0x4e), region = 28  ;;  %s698_s30 = sand.u32 (!%p674_p2), 1, %s551_s10  }
  0x35   : > { %s358_s6 = sshll.u32 (!%p674_p2), %s698_s30, 3  ;;  %s165_s7 = scalar_lea.sflag (!%p674_p2), [#allocation3], %s698_s30 }
  0x36   : > { %s168_s14 = scalar_lea.vmem (!%p674_p2), [#allocation2], %s358_s6 }
  0x39   : > { %534 = dma.done.wait (%p625_p6), %s165_s7, 128  }
  0x3a   : > { %536 = vsyncadd (%p625_p6), %s165_s7, 4294967168  ;;  %s359_s4 = sshll.u32 %s698_s30, 2  ;;  %s175_s26 = scalar_lea.sflag [#allocation6], %s698_s30 }
  0x3b   : > { %s178_s8 = scalar_lea.vmem [#allocation5], %s359_s4 }
  0x3c   : > { %538 = dma.done.wait (%p625_p6), %s175_s26, 64  }
  0x3d   : > { %540 = vsyncadd (%p625_p6), %s175_s26, 4294967232  ;;  %s367_s16 = sshll.u32 %s603_s13, 3  ;;  %vm232_vm0 = vcmask 254976   ;;  %s204_s3 = scalar_lea.vmem [#allocation7], %s358_s6  ;;  %v208_v0 = vld [vmem:[%s168_s14] sm:$0x3] }
  0x3e   : > { %s249_s29 = scalar_lea.hbm %s751_s2, %s367_s16  ;;  %s250_s5 = sshll.u32 %s204_s3, 4  ;;  %v425_v1 = vld [vmem:[%s178_s8] ss:$0 sm:$0xff]  ;;  %v209_v2 = vld [vmem:[%s168_s14 + $0x2] sm:$0x3]  ;;  %s251_s5 = int_to_ptr.vmem [resolvable:$true] %s250_s5 }
  0x3f   : > { %s252_s24 = sshll.u32 %s249_s29, 4  ;;  %v426_v3 = vld [vmem:[%s178_s8 + $0x1] ss:$0 sm:$0xff]  ;;  %v228_v4 = vadd.f32 %v425_v1, %v208_v0  ;;  %v210_v5 = vld [vmem:[%s168_s14 + $0x4] sm:$0x3]  ;;  %s238_s13 = scalar_lea.sflag [#allocation4], %s698_s30  ;;  %s253_s24 = int_to_ptr.hbm [resolvable:$true] %s252_s24 }
  0x40   : > { %v427_v6 = vld [vmem:[%s178_s8 + $0x2] ss:$0 sm:$0xff]  ;;  %v229_v7 = vadd.f32 %v426_v3, %v209_v2  ;;  %v211_v8 = vld [vmem:[%s168_s14 + $0x6] sm:$0x3]  ;;  %v428_v9 = vld [vmem:[%s178_s8 + $0x3] ss:$0 sm:$0xff] }
  0x41   : > { %233 = vst.msk [vmem:[%s204_s3] sm:$0x3] %vm232_vm0, %v228_v4  ;;  %v230_v10 = vadd.f32 %v427_v6, %v210_v5  ;;  %v231_v11 = vadd.f32 %v428_v9, %v211_v8  ;;  %s503_s20 = sshra.s32 %s253_s24, 4  ;;  %s509_s27 = scalar_lea.hbm %s751_s2, 16  ;;  %s504_s20 = int_to_ptr.hbm [resolvable:$true] %s503_s20 }
  0x42   : > { %234 = vst.msk [vmem:[%s204_s3 + $0x2] sm:$0x3] %vm232_vm0, %v229_v7  ;;  %s505_s25 = scalar_lea.hbm %s504_s20, 8  ;;  %p510_p10 = scmp.lt.s32.totalorder %s504_s20, %s751_s2 }
  0x43   : > { %235 = vst.msk [vmem:[%s204_s3 + $0x4] sm:$0x3] %vm232_vm0, %v230_v10  ;;  %p506_p6 = scmp.ne.s32.totalorder %s504_s20, %s505_s25  ;;  %p511_p2 = scmp.lt.s32.totalorder %s509_s27, %s505_s25 }
  0x44   : > { %236 = vst.msk [vmem:[%s204_s3 + $0x6] sm:$0x3] %vm232_vm0, %v231_v11 }
  0x45   : > { %p507_p13 = pnand %p506_p6, %p632_p11  ;;  %p512_p9 = por %p511_p2, %p510_p10 }
  0x47   : > { %p508_p3 = pneg %p507_p13 }
  0x49   : > { %p513_p0 = pnand %p512_p9, %p508_p3 }
  0x4b   : > { %516 = shalt.err (!%p513_p0)
}
  0x4c   : > { %s565_s30 = smov 32   ;;  %s566_s14 = smov 2  }
  0x4d   : > { %372 = dma.vmem_to_hbm [thread:$0]  (%p632_p11), %s251_s5, 128, %s253_s24, %s238_s13, %s565_s30, %s565_s30, %s566_s14  }
  0x4e PF: > { %s267_s4 = sand.u32 1, %s547_s9   ;;  %p758_p1 = scmp.ge.s32.totalorder %s559_s12, 2 }
  0x4f   : > { %s268_s26 = scalar_lea.sflag [#allocation4], %s267_s4 }
  0x50   : > { %p382_p4 = pnand %p758_p1, %p636_p12 }
  0x52   : > { %p383_p7 = pneg %p382_p4 }
  0x54   : > { %542 = dma.done.wait (%p383_p7), %s268_s26, 128  }
  0x55   : > { %544 = vsyncadd (%p383_p7), %s268_s26, 4294967168  ;;  %p18_p5 = scmp.ge.s32.totalorder %s607_s15, 4   ;;  %s759_s9 = smov %s551_s10 }
  0x56   : > { %s760_s10 = smov %s555_s11  ;;  %s761_s11 = smov %s619_s18 }
  0x57   : > { %s762_s12 = smov %s607_s15  ;;  %20 = sbr.rel (!%p18_p5) target bundleno = 7 (0x7), region = 86 }
  0x5c   :  { %274 = vsyncpa [#allocation3], 1 }
  0x5d   :  { %276 = vsyncpa [#allocation3 + $0x1], 1 }
  0x5e   :  { %277 = vsyncpa [#allocation6], 1 }
  0x5f   :  { %279 = vsyncpa [#allocation6 + $0x1], 1 }
  0x60   :  { %280 = vsyncpa [#allocation4], 1 }
  0x61   :  { %282 = vsyncpa [#allocation4 + $0x1], 1 }

</bundles_post_ra>
